<compile_context>
chip_gen: v5e
topology: v5e:2x2
jax: 0.10.0
libtpu: 0.0.40
codegen_flags: <defaults>
</compile_context>

<pallas_src>
import functools

import jax
import jax.numpy as jnp
from jax import lax
from jax.experimental import pallas as pl
from jax.experimental.pallas import tpu as pltpu

EPS = 1e-5          # nn.GroupNorm default eps (torch_gn=True path)
GATE = 0.5          # gate_treshold


def _sru_kernel(x_ref, ab_ref, o_ref, *, cg, hw, gate, eps):
    # x_ref : (Bn, G, L)   block of samples, L = cg*hw
    # ab_ref: (2, G, cg)   fused compact per-channel params:
    #                        ab[0] = weight * w_gamma, ab[1] = bias * w_gamma
    # o_ref : (Bn, G, L)
    x = x_ref[...].astype(jnp.float32)                       # (Bn, G, L)
    g = x.shape[1]
    l = x.shape[2]
    inv_l = 1.0 / float(l)

    # --- GroupNorm statistics (two-pass, matches torch numerics) ---
    mean = jnp.sum(x, axis=2, keepdims=True) * inv_l         # (Bn, G, 1)
    d = x - mean
    var = jnp.sum(d * d, axis=2, keepdims=True) * inv_l      # (Bn, G, 1)
    xn = d * lax.rsqrt(var + eps)                            # (Bn, G, L)

    # --- expand compact per-channel params along the lane axis ---
    # Channel j of a group occupies lanes [j*hw, (j+1)*hw).  One lane-iota
    # plus (cg-1) compare/selects builds the (G, L) expansion in-register,
    # shared by every sample of the block.
    a = jnp.broadcast_to(ab_ref[0, :, 0:1].astype(jnp.float32), (g, l))
    b = jnp.broadcast_to(ab_ref[1, :, 0:1].astype(jnp.float32), (g, l))
    if cg > 1:
        lane = lax.broadcasted_iota(jnp.int32, (g, l), 1)
        for j in range(1, cg):
            sel = lane >= j * hw
            a = jnp.where(sel, ab_ref[0, :, j:j + 1].astype(jnp.float32), a)
            b = jnp.where(sel, ab_ref[1, :, j:j + 1].astype(jnp.float32), b)

    # --- gating:  rew = sigmoid(gn * w_gamma) = sigmoid(xn*a + b) ---
    rew = jax.nn.sigmoid(xn * a + b)                         # (Bn, G, L)
    px = rew * x
    keep = rew > gate
    x1 = jnp.where(keep, x, px)                   # == where(rew>T, 1, rew)*x
    x2 = jnp.where(keep, jnp.zeros_like(px), px)  # == where(rew>T, 0, rew)*x

    # --- reconstruct: split at C//2 == G//2 groups, cross-add, concat ---
    h = g // 2
    o_ref[:, :h, :] = (x1[:, :h] + x2[:, h:]).astype(o_ref.dtype)
    o_ref[:, h:, :] = (x1[:, h:] + x2[:, :h]).astype(o_ref.dtype)


def _pick_batch_block(n, bytes_per_sample, target_bytes=2 << 20):
    """Largest divisor of n whose x-block stays around `target_bytes`."""
    bn = max(1, min(n, target_bytes // max(1, bytes_per_sample)))
    while n % bn:
        bn -= 1
    return bn


def sru_pallas(x, weight, bias, group_num=16, gate_threshold=GATE, eps=EPS):
    """SRU forward. x: (N, C, H, W); weight/bias: (C,) GroupNorm affine."""
    n, c, hh, ww = x.shape
    g = group_num
    assert c % g == 0, "channels must be divisible by group_num"
    assert g % 2 == 0, "channel split at C//2 must land on a group boundary"
    cg = c // g
    hw = hh * ww
    l = cg * hw
    # Note: lane-dense stores need l % 128 == 0; the G//2 split is
    # sublane-aligned when g % 16 == 0.  Other configs are correct but slower.

    x_g = x.reshape(n, g, l)

    # Fused compact per-channel params (f32): gn*w_gamma == xn*(w*wg) + b*wg.
    w_gamma = weight / jnp.sum(weight)
    ab = jnp.stack(
        [(weight * w_gamma).reshape(g, cg),
         (bias * w_gamma).reshape(g, cg)], axis=0).astype(jnp.float32)

    # Batch several samples per grid step so per-step overhead and DMA setup
    # are amortized; ~2 MiB blocks * 2 (in+out) * 2 (double buffering) stays
    # well under every generation's scoped-VMEM default.
    # TODO(synk): for very large (C//G)*H*W (single sample > VMEM) add a
    # lane-tile reduction grid axis with resident per-group accumulators.
    bytes_per_sample = c * hw * x.dtype.itemsize
    bn = _pick_batch_block(n, bytes_per_sample)

    kernel = functools.partial(_sru_kernel, cg=cg, hw=hw,
                               gate=gate_threshold, eps=eps)

    out = pl.pallas_call(
        kernel,
        out_shape=jax.ShapeDtypeStruct((n, g, l), x.dtype),
        grid_spec=pltpu.PrefetchScalarGridSpec(
            num_scalar_prefetch=0,
            grid=(n // bn,),
            in_specs=[
                pl.BlockSpec((bn, g, l), lambda i: (i, 0, 0)),
                # grid-invariant compact params (a few hundred bytes)
                pl.BlockSpec((2, g, cg), lambda i: (0, 0, 0)),
            ],
            out_specs=pl.BlockSpec((bn, g, l), lambda i: (i, 0, 0)),
        ),
        compiler_params=pltpu.CompilerParams(
            dimension_semantics=("parallel",),
            vmem_limit_bytes=32 * 1024 * 1024),
    )(x_g, ab)

    return out.reshape(n, c, hh, ww)


def sru_ref(x, weight, bias, group_num=16):
    """Pure-JAX reference replicating the PyTorch SRU forward (torch_gn=True)."""
    N, C, H, W = x.shape
    G = group_num
    xg = x.reshape(N, G, -1)
    mean = xg.mean(axis=2, keepdims=True)
    var = ((xg - mean) ** 2).mean(axis=2, keepdims=True)
    xn = ((xg - mean) / jnp.sqrt(var + EPS)).reshape(N, C, H, W)
    gn = xn * weight.reshape(1, C, 1, 1) + bias.reshape(1, C, 1, 1)
    wg = (weight / jnp.sum(weight)).reshape(1, C, 1, 1)
    rew = jax.nn.sigmoid(gn * wg)
    w1 = jnp.where(rew > GATE, jnp.ones_like(rew), rew)
    w2 = jnp.where(rew > GATE, jnp.zeros_like(rew), rew)
    x1 = w1 * x
    x2 = w2 * x
    half = C // 2
    return jnp.concatenate(
        [x1[:, :half] + x2[:, half:], x1[:, half:] + x2[:, :half]], axis=1)


if __name__ == "__main__":
    N, C, H, W = 2, 32, 16, 16      # C must be divisible by group_num=16
    G = 16

    key = jax.random.PRNGKey(0)
    kx, kw, kb = jax.random.split(key, 3)
    x = jax.random.normal(kx, (N, C, H, W), dtype=jnp.float32)
    # deterministic GroupNorm affine params (positive weights so sum != 0)
    weight = jax.random.uniform(kw, (C,), dtype=jnp.float32,
                                minval=0.5, maxval=1.5)
    bias = 0.1 * jax.random.normal(kb, (C,), dtype=jnp.float32)

    y = sru_pallas(x, weight, bias, group_num=G)
    y = jax.block_until_ready(y)

    y_ref = sru_ref(x, weight, bias, group_num=G)
    assert y.shape == (N, C, H, W)
    assert jnp.allclose(y, y_ref, atol=1e-4, rtol=1e-4), \
        float(jnp.max(jnp.abs(y - y_ref)))

    print("KERNEL_OK")
</pallas_src>

<mosaic_0001>
module attributes {stable_mosaic.version = 11 : i64} {
  func.func @_sru_kernel(%arg0: i32, %arg1: memref<2x16x512xf32, #tpu.memory_space<vmem>>, %arg2: memref<2x16x2xf32, #tpu.memory_space<vmem>>, %arg3: memref<2x16x512xf32, #tpu.memory_space<vmem>>) attributes {dimension_semantics = [#tpu.dimension_semantics<parallel>], iteration_bounds = array<i64: 1>, scalar_prefetch = 0 : i64, scratch_operands = 0 : i64, tpu.core_type = #tpu.core_type<tc>, window_params = [{transform_indices = @transform_0, window_bounds = array<i64: 2, 16, 512>}, {pipeline_mode = #tpu.pipeline_mode<synchronous>, transform_indices = @transform_1, window_bounds = array<i64: 2, 16, 2>}, {transform_indices = @transform_2, window_bounds = array<i64: 2, 16, 512>}]} {
    %c0 = arith.constant 0 : index
    %c0_0 = arith.constant 0 : index
    %c0_1 = arith.constant 0 : index
    %0 = vector.load %arg1[%c0, %c0_0, %c0_1] : memref<2x16x512xf32, #tpu.memory_space<vmem>>, vector<2x16x512xf32>
    %cst = arith.constant dense<0.000000e+00> : vector<2x16xf32>
    %1 = vector.multi_reduction <add>, %0, %cst [2] : vector<2x16x512xf32> to vector<2x16xf32>
    %2 = vector.shape_cast %1 : vector<2x16xf32> to vector<2x16x1xf32>
    %cst_2 = arith.constant 0.001953125 : f32
    %3 = vector.broadcast %cst_2 : f32 to vector<2x16x1xf32>
    %4 = arith.mulf %2, %3 : vector<2x16x1xf32>
    %5 = vector.broadcast %4 : vector<2x16x1xf32> to vector<2x16x512xf32>
    %6 = arith.subf %0, %5 : vector<2x16x512xf32>
    %7 = arith.mulf %6, %6 : vector<2x16x512xf32>
    %cst_3 = arith.constant dense<0.000000e+00> : vector<2x16xf32>
    %8 = vector.multi_reduction <add>, %7, %cst_3 [2] : vector<2x16x512xf32> to vector<2x16xf32>
    %9 = vector.shape_cast %8 : vector<2x16xf32> to vector<2x16x1xf32>
    %cst_4 = arith.constant 0.001953125 : f32
    %10 = vector.broadcast %cst_4 : f32 to vector<2x16x1xf32>
    %11 = arith.mulf %9, %10 : vector<2x16x1xf32>
    %cst_5 = arith.constant 9.99999974E-6 : f32
    %12 = vector.broadcast %cst_5 : f32 to vector<2x16x1xf32>
    %13 = arith.addf %11, %12 : vector<2x16x1xf32>
    %14 = math.rsqrt %13 : vector<2x16x1xf32>
    %15 = vector.broadcast %14 : vector<2x16x1xf32> to vector<2x16x512xf32>
    %16 = arith.mulf %6, %15 : vector<2x16x512xf32>
    %c0_6 = arith.constant 0 : index
    %c0_7 = arith.constant 0 : index
    %c0_8 = arith.constant 0 : index
    %17 = vector.load %arg2[%c0_6, %c0_7, %c0_8] : memref<2x16x2xf32, #tpu.memory_space<vmem>>, vector<1x16x1xf32>
    %18 = vector.shape_cast %17 : vector<1x16x1xf32> to vector<16x1xf32>
    %19 = vector.shape_cast %18 : vector<16x1xf32> to vector<16x1xf32>
    %20 = vector.broadcast %19 : vector<16x1xf32> to vector<16x512xf32>
    %c1 = arith.constant 1 : index
    %c0_9 = arith.constant 0 : index
    %c0_10 = arith.constant 0 : index
    %21 = vector.load %arg2[%c1, %c0_9, %c0_10] : memref<2x16x2xf32, #tpu.memory_space<vmem>>, vector<1x16x1xf32>
    %22 = vector.shape_cast %21 : vector<1x16x1xf32> to vector<16x1xf32>
    %23 = vector.shape_cast %22 : vector<16x1xf32> to vector<16x1xf32>
    %24 = vector.broadcast %23 : vector<16x1xf32> to vector<16x512xf32>
    %25 = tpu.iota {dimensions = array<i32: 1>} : vector<16x512xi32>
    %c256_i32 = arith.constant 256 : i32
    %26 = vector.broadcast %c256_i32 : i32 to vector<16x512xi32>
    %27 = arith.cmpi sge, %25, %26 : vector<16x512xi32>
    %c0_11 = arith.constant 0 : index
    %c0_12 = arith.constant 0 : index
    %c1_13 = arith.constant 1 : index
    %28 = vector.load %arg2[%c0_11, %c0_12, %c1_13] : memref<2x16x2xf32, #tpu.memory_space<vmem>>, vector<1x16x1xf32>
    %29 = vector.shape_cast %28 : vector<1x16x1xf32> to vector<16x1xf32>
    %30 = vector.shape_cast %29 : vector<16x1xf32> to vector<16x1xf32>
    %31 = vector.broadcast %30 : vector<16x1xf32> to vector<16x512xf32>
    %32 = arith.select %27, %31, %20 : vector<16x512xi1>, vector<16x512xf32>
    %c1_14 = arith.constant 1 : index
    %c0_15 = arith.constant 0 : index
    %c1_16 = arith.constant 1 : index
    %33 = vector.load %arg2[%c1_14, %c0_15, %c1_16] : memref<2x16x2xf32, #tpu.memory_space<vmem>>, vector<1x16x1xf32>
    %34 = vector.shape_cast %33 : vector<1x16x1xf32> to vector<16x1xf32>
    %35 = vector.shape_cast %34 : vector<16x1xf32> to vector<16x1xf32>
    %36 = vector.broadcast %35 : vector<16x1xf32> to vector<16x512xf32>
    %37 = arith.select %27, %36, %24 : vector<16x512xi1>, vector<16x512xf32>
    %38 = vector.shape_cast %32 : vector<16x512xf32> to vector<1x16x512xf32>
    %39 = vector.broadcast %38 : vector<1x16x512xf32> to vector<2x16x512xf32>
    %40 = arith.mulf %16, %39 : vector<2x16x512xf32>
    %41 = vector.shape_cast %37 : vector<16x512xf32> to vector<1x16x512xf32>
    %42 = vector.broadcast %41 : vector<1x16x512xf32> to vector<2x16x512xf32>
    %43 = arith.addf %40, %42 : vector<2x16x512xf32>
    %44 = arith.negf %43 : vector<2x16x512xf32>
    %45 = math.exp %44 : vector<2x16x512xf32>
    %cst_17 = arith.constant 1.000000e+00 : f32
    %46 = vector.broadcast %cst_17 : f32 to vector<2x16x512xf32>
    %47 = arith.addf %46, %45 : vector<2x16x512xf32>
    %48 = arith.divf %46, %47 : vector<2x16x512xf32>
    %49 = arith.mulf %48, %0 : vector<2x16x512xf32>
    %cst_18 = arith.constant 5.000000e-01 : f32
    %50 = vector.broadcast %cst_18 : f32 to vector<2x16x512xf32>
    %51 = arith.cmpf ogt, %48, %50 : vector<2x16x512xf32>
    %52 = arith.select %51, %0, %49 : vector<2x16x512xi1>, vector<2x16x512xf32>
    %cst_19 = arith.constant 0.000000e+00 : f32
    %53 = vector.broadcast %cst_19 : f32 to vector<2x16x512xf32>
    %54 = arith.select %51, %53, %49 : vector<2x16x512xi1>, vector<2x16x512xf32>
    %55 = vector.extract_strided_slice %52 {offsets = [0, 0, 0], sizes = [2, 8, 512], strides = [1, 1, 1]} : vector<2x16x512xf32> to vector<2x8x512xf32>
    %56 = vector.extract_strided_slice %54 {offsets = [0, 8, 0], sizes = [2, 8, 512], strides = [1, 1, 1]} : vector<2x16x512xf32> to vector<2x8x512xf32>
    %57 = arith.addf %55, %56 : vector<2x8x512xf32>
    %c0_20 = arith.constant 0 : index
    %c0_21 = arith.constant 0 : index
    %c0_22 = arith.constant 0 : index
    %58 = vector.load %arg3[%c0_20, %c0_21, %c0_22] : memref<2x16x512xf32, #tpu.memory_space<vmem>>, vector<2x8x512xf32>
    tpu.vector_store %arg3[%c0_20, %c0_21, %c0_22], %57 {strides = array<i32>} : memref<2x16x512xf32, #tpu.memory_space<vmem>>, vector<2x8x512xf32>,
    %59 = vector.extract_strided_slice %52 {offsets = [0, 8, 0], sizes = [2, 8, 512], strides = [1, 1, 1]} : vector<2x16x512xf32> to vector<2x8x512xf32>
    %60 = vector.extract_strided_slice %54 {offsets = [0, 0, 0], sizes = [2, 8, 512], strides = [1, 1, 1]} : vector<2x16x512xf32> to vector<2x8x512xf32>
    %61 = arith.addf %59, %60 : vector<2x8x512xf32>
    %c0_23 = arith.constant 0 : index
    %c8 = arith.constant 8 : index
    %c0_24 = arith.constant 0 : index
    %62 = vector.load %arg3[%c0_23, %c8, %c0_24] : memref<2x16x512xf32, #tpu.memory_space<vmem>>, vector<2x8x512xf32>
    tpu.vector_store %arg3[%c0_23, %c8, %c0_24], %61 {strides = array<i32>} : memref<2x16x512xf32, #tpu.memory_space<vmem>>, vector<2x8x512xf32>,
    return
  }
  func.func @transform_0(%arg0: i32) -> (i32, i32, i32) {
    %c0_i32 = arith.constant 0 : i32
    %c0_i32_0 = arith.constant 0 : i32
    %c0_i32_1 = arith.constant 0 : i32
    return %arg0, %c0_i32, %c0_i32_0 : i32, i32, i32
  }
  func.func @transform_1(%arg0: i32) -> (i32, i32, i32) {
    %c0_i32 = arith.constant 0 : i32
    %c0_i32_0 = arith.constant 0 : i32
    %c0_i32_1 = arith.constant 0 : i32
    %c0_i32_2 = arith.constant 0 : i32
    return %c0_i32, %c0_i32_0, %c0_i32_1 : i32, i32, i32
  }
  func.func @transform_2(%arg0: i32) -> (i32, i32, i32) {
    %c0_i32 = arith.constant 0 : i32
    %c0_i32_0 = arith.constant 0 : i32
    %c0_i32_1 = arith.constant 0 : i32
    return %arg0, %c0_i32, %c0_i32_0 : i32, i32, i32
  }
}

</mosaic_0001>

<bundles_post_ra>
// kernel: tpu_custom_call.1
= control target key start
LH: loop header
LB: loop body
LE: loop exit
PB: predicated region body
PF: predicated region fallthrough
CT: control target
= control target key end

     0   :  { %7 = vsyncpa [#allocation3], 0  ;;  %s1544_s0 = inlined_call_operand.hbm [shape: f32[2,16,512], index: 0, kind: input, shape index: {}]   ;;  %s1545_s1 = inlined_call_operand.vmem [shape: f32[2,16,2], index: 1, kind: input, shape index: {}]   ;;  %s1546_s2 = inlined_call_operand.hbm [shape: f32[2,16,512], index: 2, kind: output, shape index: {}]  }
   0x1   :  { %8 = vsyncpa [#allocation4], 0  ;;  %s13_s11 = sshll.u32 %s1544_s0, 4  ;;  %s866_s12 = smov [#allocation2]   ;;  %s14_s11 = int_to_ptr.hbm [resolvable:$true] %s13_s11 }
   0x2   :  { %s15_s13 = sshll.u32 %s866_s12, 4  ;;  %s867_s14 = smov 512   ;;  %s16_s13 = int_to_ptr.vmem [resolvable:$true] %s15_s13 }
   0x3   :  { %s868_s15 = smov 32  }
   0x4   :  { %21 = dma.hbm_to_vmem [thread:$0]  %s14_s11, 2048, %s16_s13, [#allocation3], %s867_s14, %s867_s14, %s868_s15  }
   0x5   :  { %862 = dma.done.wait [#allocation3], 2048  }
   0x6   :  { %863 = vsyncadd [#allocation3], 4294965248  ;;  %v869_v0 = vmov 1   ;;  %v894_v1 = vld [vmem:[#allocation2 + $0x40] sm:$0xff]  ;;  %v896_v2 = vld [vmem:[#allocation2 + $0x48] sm:$0xff]  ;;  %v870_v28 = vmov 0  }
   0x7   :  { %727 = vset.pattern.permute.xlu1 %v869_v0  ;;  %v38_v3 = vld [vmem:[#allocation2 + $0x50] sm:$0xff]  ;;  %v54_v4 = vadd.f32 %v896_v2, %v894_v1  ;;  %v900_v5 = vld [vmem:[#allocation2] sm:$0xff]  ;;  %v902_v6 = vld [vmem:[#allocation2 + $0x8] sm:$0xff]  ;;  %725 = vset.pattern.permute.xlu2 %v870_v28  ;;  %s688_s26 = sshll.u32 %s1546_s2, 4  ;;  %s689_s26 = int_to_ptr.hbm [resolvable:$true] %s688_s26 }
   0x8   :  { %v39_v7 = vld [vmem:[#allocation2 + $0x58] sm:$0xff]  ;;  %v904_v8 = vld [vmem:[#allocation2 + $0x10] sm:$0xff]  ;;  %v44_v9 = vadd.f32 %v902_v6, %v900_v5  ;;  %v908_v10 = vld [vmem:[#allocation2 + $0x60] sm:$0xff]  ;;  %726 = vset.pattern.permute.xlu0 %v870_v28 }
   0x9   :  { %v55_v11 = vadd.f32 %v54_v4, %v38_v3  ;;  %v910_v12 = vld [vmem:[#allocation2 + $0x18] sm:$0xff]  ;;  %v912_v13 = vld [vmem:[#allocation2 + $0x68] sm:$0xff]  ;;  %v42_v15 = vld [vmem:[#allocation2 + $0x70] sm:$0xff] }
   0xa   :  { %v45_v14 = vadd.f32 %v44_v9, %v904_v8  ;;  %v59_v16 = vadd.f32 %v912_v13, %v908_v10  ;;  %v917_v17 = vld [vmem:[#allocation2 + $0x20] sm:$0xff]  ;;  %v919_v18 = vld [vmem:[#allocation2 + $0x28] sm:$0xff]  ;;  %v921_v20 = vld [vmem:[#allocation2 + $0x30] sm:$0xff] }
   0xb   :  { %v56_v19 = vadd.f32 %v55_v11, %v39_v7  ;;  %v49_v21 = vadd.f32 %v919_v18, %v917_v17  ;;  %v43_v24 = vld [vmem:[#allocation2 + $0x78] sm:$0xff]  ;;  %v184_v27 = vld [vmem:[%s1545_s1] sm:$0xff] }
   0xc   :  { %v46_v22 = vadd.f32 %v45_v14, %v910_v12  ;;  %v60_v23 = vadd.f32 %v59_v16, %v42_v15  ;;  %v35_v26 = vld [vmem:[#allocation2 + $0x38] sm:$0xff]  ;;  %188 = vperm.xlu2 %725, %v184_v27  }
   0xd   :  { %57 = vadd.xlane.f32.xlu1 %v56_v19  ;;  %v50_v25 = vadd.f32 %v49_v21, %v921_v20  ;;  %v702_v31 = vld [vmem:[%s1545_s1 + $0x18] sm:$0xff] }
   0xe   :  { %47 = vadd.xlane.f32.xlu0 %v46_v22  ;;  %v61_v29 = vadd.f32 %v60_v23, %v43_v24 }
   0xf   :  { %v51_v30 = vadd.f32 %v50_v25, %v35_v26 }
  0x14   :  { %728 = vset.pattern.permute.xlu2 %v869_v0 }
  0x15   :  { %62 = vadd.xlane.f32.xlu1 %v61_v29 }
  0x16   :  { %52 = vadd.xlane.f32.xlu0 %v51_v30 }
  0x2e   :  { %219 = vperm.xlu1 %727, %v184_v27  }
  0x36   :  { %730 = vset.pattern.permute.xlu1 %v870_v28 }
  0x37   :  { %206 = vperm.xlu1 %730, %v702_v31  }
  0x3f   :  { %732 = vset.pattern.permute.xlu1 %v869_v0 }
  0x80   :  { %v58_v32 = vpop.xlane.xlu1 %57 }
  0x81   :  { %v66_v33 = vmul.f32 0.001953125, %v58_v32  ;;  %v48_v34 = vpop.xlane.xlu0 %47 }
  0x82   :  { %v64_v35 = vmul.f32 0.001953125, %v48_v34  ;;  %v701_v34 = vld [vmem:[%s1545_s1 + $0x10] sm:$0xff] }
  0x83   :  { %v939_v36 = vsub.f32 %v894_v1, %v66_v33  ;;  %v942_v37 = vsub.f32 %v896_v2, %v66_v33  ;;  %v944_v38 = vsub.f32 %v38_v3, %v66_v33  ;;  %v955_v42 = vsub.f32 %v39_v7, %v66_v33  ;;  %v185_v33 = vld [vmem:[%s1545_s1 + $0x8] sm:$0xff]  ;;  %s871_s1 = smov [#allocation5]  }
  0x84   :  { %v947_v39 = vsub.f32 %v900_v5, %v64_v35  ;;  %v950_v40 = vsub.f32 %v902_v6, %v64_v35  ;;  %v953_v41 = vsub.f32 %v904_v8, %v64_v35  ;;  %v962_v45 = vsub.f32 %v910_v12, %v64_v35  ;;  %s686_s23 = sshll.u32 %s871_s1, 4  ;;  %s687_s23 = int_to_ptr.vmem [resolvable:$true] %s686_s23 }
  0x85   :  { %v92_v43 = vmul.f32 %v939_v36, %v939_v36  ;;  %v93_v44 = vmul.f32 %v942_v37, %v942_v37  ;;  %v94_v48 = vmul.f32 %v944_v38, %v944_v38  ;;  %v95_v55 = vmul.f32 %v955_v42, %v955_v42 }
  0x86   :  { %v84_v46 = vmul.f32 %v947_v39, %v947_v39  ;;  %v85_v47 = vmul.f32 %v950_v40, %v950_v40  ;;  %v86_v51 = vmul.f32 %v953_v41, %v953_v41  ;;  %v87_v58 = vmul.f32 %v962_v45, %v962_v45 }
  0x87   :  { %v110_v49 = vadd.f32 %v93_v44, %v92_v43  ;;  %v189_v43 = vpop.permute.xlu2 %188 }
  0x88   :  { %v63_v50 = vpop.xlane.xlu1 %62  ;;  %v100_v52 = vadd.f32 %v85_v47, %v84_v46 }
  0x89   :  { %v67_v53 = vmul.f32 0.001953125, %v63_v50  ;;  %v53_v54 = vpop.xlane.xlu0 %52  ;;  %v111_v56 = vadd.f32 %v110_v49, %v94_v48 }
  0x8a   :  { %v65_v57 = vmul.f32 0.001953125, %v53_v54  ;;  %v101_v59 = vadd.f32 %v100_v52, %v86_v51 }
  0x8b   :  { %v977_v60 = vsub.f32 %v908_v10, %v67_v53  ;;  %v980_v61 = vsub.f32 %v912_v13, %v67_v53  ;;  %v112_v62 = vadd.f32 %v111_v56, %v95_v55  ;;  %v982_v63 = vsub.f32 %v42_v15, %v67_v53 }
  0x8c   :  { %v985_v3 = vsub.f32 %v917_v17, %v65_v57  ;;  %v988_v4 = vsub.f32 %v919_v18, %v65_v57  ;;  %v102_v7 = vadd.f32 %v101_v59, %v87_v58  ;;  %v990_v9 = vsub.f32 %v43_v24, %v67_v53 }
  0x8d   :  { %113 = vadd.xlane.f32.xlu0 %v112_v62  ;;  %v96_v11 = vmul.f32 %v977_v60, %v977_v60  ;;  %v97_v14 = vmul.f32 %v980_v61, %v980_v61  ;;  %v997_v16 = vsub.f32 %v921_v20, %v65_v57  ;;  %v999_v15 = vsub.f32 %v35_v26, %v65_v57 }
  0x8e   :  { %103 = vadd.xlane.f32.xlu2 %v102_v7  ;;  %v88_v19 = vmul.f32 %v985_v3, %v985_v3  ;;  %v89_v21 = vmul.f32 %v988_v4, %v988_v4  ;;  %v98_v22 = vmul.f32 %v982_v63, %v982_v63  ;;  %v99_v20 = vmul.f32 %v990_v9, %v990_v9 }
  0x8f   :  { %v115_v23 = vadd.f32 %v97_v14, %v96_v11  ;;  %v90_v24 = vmul.f32 %v997_v16, %v997_v16  ;;  %v91_v26 = vmul.f32 %v999_v15, %v999_v15 }
  0x90   :  { %v105_v25 = vadd.f32 %v89_v21, %v88_v19 }
  0x91   :  { %v116_v27 = vadd.f32 %v115_v23, %v98_v22 }
  0x92   :  { %v106_v29 = vadd.f32 %v105_v25, %v90_v24 }
  0x93   :  { %v117_v30 = vadd.f32 %v116_v27, %v99_v20 }
  0x94   :  { %v107_v32 = vadd.f32 %v106_v29, %v91_v26 }
  0x95   :  { %118 = vadd.xlane.f32.xlu1 %v117_v30 }
  0x96   :  { %108 = vadd.xlane.f32.xlu2 %v107_v32 }
  0xa0   :  { %v1022_v35 = vpop.permute.xlu1 %219 }
  0xa1   :  { %193 = vperm.xlu0 %726, %v185_v33  }
  0xa9   :  { %733 = vset.pattern.permute.xlu0 %v869_v0  ;;  %v1024_v44 = vpop.permute.xlu1 %206 }
  0xae   :  { %239 = vperm.xlu1 %732, %v702_v31   ;;  %223 = vperm.xlu2 %728, %v185_v33  }
  0xb6   :  { %729 = vset.pattern.permute.xlu2 %v870_v28 }
  0xb7   :  { %201 = vperm.xlu2 %729, %v701_v34  }
  0xbf   :  { %731 = vset.pattern.permute.xlu2 %v869_v0 }
  0xc0   :  { %235 = vperm.xlu2 %731, %v701_v34  }
 0x100   :  { %v114_v46 = vpop.xlane.xlu0 %113 }
 0x101   :  { %v104_v47 = vpop.xlane.xlu2 %103  ;;  %v122_v48 = vmul.f32 0.001953125, %v114_v46 }
 0x102   :  { %v120_v31 = vmul.f32 0.001953125, %v104_v47 }
 0x103   :  { %v126_v49 = vadd.f32 1e-05, %v122_v48 }
 0x104   :  { %v124_v50 = vadd.f32 1e-05, %v120_v31 }
 0x105   :  { %734 = vrsqrt.f32 %v126_v49  ;;  %vm154_vm2 = vweird.f32 %v126_v49 }
 0x106   :  { %736 = vrsqrt.f32 %v124_v50  ;;  %vm134_vm3 = vweird.f32 %v124_v50 }
 0x108   :  { %v119_v51 = vpop.xlane.xlu1 %118 }
 0x109   :  { %v123_v52 = vmul.f32 0.001953125, %v119_v51  ;;  %v109_v28 = vpop.xlane.xlu2 %108 }
 0x10a   :  { %v121_v53 = vmul.f32 0.001953125, %v109_v28 }
 0x10b   :  { %v735_v54 = vpop.eup %734  ;;  %v1026_v0 = vadd.f32 1e-05, %v123_v52 }
 0x10c   :  { %v737_v55 = vpop.eup %736  ;;  %v149_v56 = vmul.f32 %v735_v54, %v126_v49  ;;  %v1028_v57 = vadd.f32 1e-05, %v121_v53  ;;  %vm155_vm0 = vweird.f32 %v735_v54 }
 0x10d   :  { %v129_v58 = vmul.f32 %v737_v55, %v124_v50  ;;  %738 = vrsqrt.f32 %v1026_v0  ;;  %vm135_vm1 = vweird.f32 %v737_v55  ;;  %vm156_vm4 = vmor %vm154_vm2, %vm155_vm0  ;;  %vm164_vm9 = vweird.f32 %v1026_v0 }
 0x10e   :  { %v150_v59 = vmul.f32 %v735_v54, %v149_v56  ;;  %740 = vrsqrt.f32 %v1028_v57  ;;  %vm136_vm5 = vmor %vm134_vm3, %vm135_vm1  ;;  %vm144_vm8 = vweird.f32 %v1028_v57 }
 0x10f   :  { %v130_v62 = vmul.f32 %v737_v55, %v129_v58 }
 0x110   :  { %v151_v7 = vmul.f32 0.5, %v150_v59 }
 0x111   :  { %v131_v11 = vmul.f32 0.5, %v130_v62  ;;  %v1032_v14 = vpop.permute.xlu2 %223 }
 0x112   :  { %v152_v19 = vsub.f32 1.5, %v151_v7 }
 0x113   :  { %v1034_v21 = vpop.eup %738  ;;  %v132_v22 = vsub.f32 1.5, %v131_v11 }
 0x114   :  { %v741_v23 = vpop.eup %740  ;;  %v153_v24 = vmul.f32 %v735_v54, %v152_v19  ;;  %v159_v25 = vmul.f32 %v1034_v21, %v1026_v0  ;;  %vm165_vm7 = vweird.f32 %v1034_v21 }
 0x115   :  { %v133_v20 = vmul.f32 %v737_v55, %v132_v22  ;;  %v139_v27 = vmul.f32 %v741_v23, %v1028_v57  ;;  %vm145_vm6 = vweird.f32 %v741_v23  ;;  %vm166_vm11 = vmor %vm164_vm9, %vm165_vm7 }
 0x116   :  { %v157_v26 = vsel %vm156_vm4, %v735_v54, %v153_v24  ;;  %v160_v34 = vmul.f32 %v1034_v21, %v159_v25  ;;  %vm146_vm10 = vmor %vm144_vm8, %vm145_vm6 }
 0x117   :  { %v137_v29 = vsel %vm136_vm5, %v737_v55, %v133_v20  ;;  %v140_v30 = vmul.f32 %v741_v23, %v139_v27  ;;  %v176_v32 = vmul.f32 %v157_v26, %v939_v36  ;;  %v177_v33 = vmul.f32 %v157_v26, %v942_v37 }
 0x118   :  { %v168_v46 = vmul.f32 %v137_v29, %v947_v39  ;;  %v169_v47 = vmul.f32 %v137_v29, %v950_v40  ;;  %v161_v54 = vmul.f32 0.5, %v160_v34  ;;  %v170_v37 = vmul.f32 %v137_v29, %v953_v41 }
 0x119   :  { %v202_v48 = vpop.permute.xlu2 %201  ;;  %v258_v31 = vmul.f32 %v189_v43, %v176_v32  ;;  %v259_v49 = vmul.f32 %v189_v43, %v177_v33  ;;  %v141_v52 = vmul.f32 0.5, %v140_v30  ;;  %v171_v7 = vmul.f32 %v137_v29, %v962_v45 }
 0x11a   :  { %v250_v50 = vmul.f32 %v189_v43, %v168_v46  ;;  %v251_v51 = vmul.f32 %v189_v43, %v169_v47  ;;  %v162_v40 = vsub.f32 1.5, %v161_v54  ;;  %v252_v43 = vmul.f32 %v1022_v35, %v170_v37 }
 0x11b   :  { %v274_v28 = vadd.f32 %v258_v31, %v202_v48  ;;  %v275_v53 = vadd.f32 %v259_v49, %v202_v48  ;;  %v142_v39 = vsub.f32 1.5, %v141_v52  ;;  %v253_v41 = vmul.f32 %v1022_v35, %v171_v7  ;;  %v194_v49 = vpop.permute.xlu0 %193 }
 0x11c   :  { %v266_v55 = vadd.f32 %v250_v50, %v202_v48  ;;  %v267_v56 = vadd.f32 %v251_v51, %v202_v48  ;;  %v163_v24 = vmul.f32 %v1034_v21, %v162_v40  ;;  %v178_v25 = vmul.f32 %v157_v26, %v944_v38 }
 0x11d   :  { %v711_v36 = vmul.f32 -1.442695, %v274_v28  ;;  %v712_v62 = vmul.f32 -1.442695, %v275_v53  ;;  %v143_v19 = vmul.f32 %v741_v23, %v142_v39  ;;  %v179_v45 = vmul.f32 %v157_v26, %v955_v42 }
 0x11e   :  { %v703_v58 = vmul.f32 -1.442695, %v266_v55  ;;  %v704_v59 = vmul.f32 -1.442695, %v267_v56  ;;  %v1061_v47 = vsel %vm166_vm11, %v1034_v21, %v163_v24  ;;  %v260_v42 = vmul.f32 %v1022_v35, %v178_v25 }
 0x11f   :  { %742 = vpow2.f32 %v711_v36  ;;  %v1056_v33 = vsel %vm146_vm10, %v741_v23, %v143_v19  ;;  %v261_v23 = vmul.f32 %v1022_v35, %v179_v45  ;;  %v180_v31 = vmul.f32 %v1061_v47, %v977_v60 }
 0x120   :  { %744 = vpow2.f32 %v703_v58  ;;  %v172_v21 = vmul.f32 %v1056_v33, %v985_v3  ;;  %v173_v51 = vmul.f32 %v1056_v33, %v988_v4  ;;  %v181_v60 = vmul.f32 %v1061_v47, %v980_v61 }
 0x121   :  { %746 = vpow2.f32 %v704_v59  ;;  %v236_v11 = vpop.permute.xlu2 %235  ;;  %v262_v54 = vmul.f32 %v194_v49, %v180_v31 }
 0x122   :  { %748 = vpow2.f32 %v712_v62  ;;  %v268_v22 = vadd.f32 %v252_v43, %v236_v11  ;;  %v269_v30 = vadd.f32 %v253_v41, %v236_v11  ;;  %v276_v26 = vadd.f32 %v260_v42, %v236_v11 }
 0x123   :  { %v277_v50 = vadd.f32 %v261_v23, %v236_v11  ;;  %v254_v28 = vmul.f32 %v194_v49, %v172_v21  ;;  %v255_v36 = vmul.f32 %v194_v49, %v173_v51  ;;  %v263_v40 = vmul.f32 %v194_v49, %v181_v60 }
 0x124   :  { %v705_v46 = vmul.f32 -1.442695, %v268_v22  ;;  %v706_v48 = vmul.f32 -1.442695, %v269_v30  ;;  %v713_v35 = vmul.f32 -1.442695, %v276_v26  ;;  %v278_v61 = vadd.f32 %v262_v54, %v1024_v44 }
 0x125   :  { %v743_v20 = vpop.eup %742  ;;  %v714_v4 = vmul.f32 -1.442695, %v277_v50  ;;  %v270_v62 = vadd.f32 %v254_v28, %v1024_v44  ;;  %v271_v19 = vadd.f32 %v255_v36, %v1024_v44  ;;  %v279_v45 = vadd.f32 %v263_v40, %v1024_v44 }
 0x126   :  { %v745_v27 = vpop.eup %744  ;;  %v1054_v29 = vadd.f32 1.0, %v743_v20  ;;  %v1109_v42 = vmul.f32 %v1061_v47, %v982_v63 }
 0x127   :  { %v747_v32 = vpop.eup %746  ;;  %v1058_v34 = vadd.f32 1.0, %v745_v27  ;;  %v707_v41 = vmul.f32 -1.442695, %v270_v62  ;;  %v715_v27 = vmul.f32 -1.442695, %v278_v61 }
 0x128   :  { %v749_v38 = vpop.eup %748  ;;  %v1063_v57 = vadd.f32 1.0, %v747_v32  ;;  %750 = vrcp.f32 %v1054_v29  ;;  %vm471_vm12 = vweird.f32 %v1054_v29  ;;  %v475_v26 = vand.u32 2147483647, %v1054_v29 }
 0x129   :  { %v1067_v0 = vadd.f32 1.0, %v749_v38  ;;  %752 = vrcp.f32 %v1058_v34  ;;  %v708_v38 = vmul.f32 -1.442695, %v271_v19  ;;  %v355_v23 = vand.u32 2147483647, %v1058_v34 }
 0x12a   :  { %754 = vrcp.f32 %v1063_v57  ;;  %v357_v44 = vand.u32 2147483648, %v1058_v34  ;;  %v370_v31 = vand.u32 2147483647, %v1063_v57  ;;  %v477_v51 = vand.u32 2147483648, %v1054_v29 }
 0x12b   :  { %756 = vpow2.f32 %v705_v46  ;;  %vm351_vm15 = vweird.f32 %v1058_v34  ;;  %vm1128_vm0 = vcmp.eq.f32.partialorder %v355_v23, 8.507059e+37  ;;  %vm366_vm1 = vweird.f32 %v1063_v57 }
 0x12c   :  { %758 = vrcp.f32 %v1067_v0  ;;  %v372_v54 = vand.u32 2147483648, %v1063_v57  ;;  %vm1144_vm4 = vcmp.eq.f32.partialorder %v475_v26, 8.507059e+37  ;;  %vm1154_vm6 = vcmp.eq.f32.partialorder %v370_v31, 8.507059e+37 }
 0x12d   :  { %760 = vpow2.f32 %v706_v48  ;;  %v478_v40 = vor.u32 1.1754944e-38, %v477_v51  ;;  %vm486_vm9 = vweird.f32 %v1067_v0 }
 0x12e   :  { %v1079_v52 = vpop.eup %750  ;;  %762 = vpow2.f32 %v713_v35  ;;  %v373_v19 = vor.u32 1.1754944e-38, %v372_v54 }
 0x12f   :  { %v1081_v53 = vpop.eup %752  ;;  %v467_v3 = vmul.f32 %v1079_v52, %v1054_v29  ;;  %764 = vpow2.f32 %v714_v4  ;;  %vm472_vm13 = vweird.f32 %v1079_v52 }
 0x130   :  { %v1087_v55 = vpop.eup %754  ;;  %v347_v56 = vmul.f32 %v1081_v53, %v1058_v34  ;;  %vm352_vm14 = vweird.f32 %v1081_v53  ;;  %vm1140_vm3 = vmor %vm471_vm12, %vm472_vm13 }
 0x131   :  { %v757_v37 = vpop.eup %756  ;;  %v362_v59 = vmul.f32 %v1087_v55, %v1063_v57  ;;  %v468_v39 = vsub.f32 1.0, %v467_v3  ;;  %vm367_vm2 = vweird.f32 %v1087_v55  ;;  %vm1150_vm5 = vmor %vm351_vm15, %vm352_vm14 }
 0x132   :  { %v1091_v58 = vpop.eup %758  ;;  %v348_v43 = vsub.f32 1.0, %v347_v56  ;;  %v1100_v22 = vadd.f32 1.0, %v757_v37  ;;  %v358_v37 = vor.u32 1.1754944e-38, %v357_v44  ;;  %vm1173_vm8 = vmor %vm366_vm1, %vm367_vm2 }
 0x133   :  { %v761_v7 = vpop.eup %760  ;;  %v482_v11 = vmul.f32 %v1091_v58, %v1067_v0  ;;  %v363_v24 = vsub.f32 1.0, %v362_v59  ;;  %v469_v25 = vmul.f32 %v1079_v52, %v468_v39  ;;  %vm487_vm7 = vweird.f32 %v1091_v58 }
 0x134   :  { %v1103_v20 = vadd.f32 1.0, %v761_v7  ;;  %v763_v30 = vpop.eup %762  ;;  %v349_v32 = vmul.f32 %v1081_v53, %v348_v43  ;;  %766 = vrcp.f32 %v1100_v22  ;;  %v490_v43 = vand.u32 2147483647, %v1067_v0  ;;  %vm1188_vm10 = vmor %vm486_vm9, %vm487_vm7 }
 0x135   :  { %v483_v46 = vsub.f32 1.0, %v482_v11  ;;  %v765_v48 = vpop.eup %764  ;;  %v364_v21 = vmul.f32 %v1087_v55, %v363_v24  ;;  %768 = vpow2.f32 %v707_v41  ;;  %v470_v49 = vadd.f32 %v1079_v52, %v469_v25 }
 0x136   :  { %v1120_v63 = vadd.f32 1.0, %v763_v30  ;;  %770 = vrcp.f32 %v1103_v20  ;;  %v350_v50 = vadd.f32 %v1081_v53, %v349_v32  ;;  %v1133_v3 = vadd.f32 1.0, %v765_v48 }
 0x137   :  { %v484_v35 = vmul.f32 %v1091_v58, %v483_v46  ;;  %v365_v60 = vadd.f32 %v1087_v55, %v364_v21  ;;  %v474_v29 = vsel %vm1140_vm3, %v1079_v52, %v470_v49  ;;  %v716_v24 = vmul.f32 -1.442695, %v279_v45 }
 0x138   :  { %772 = vrcp.f32 %v1120_v63  ;;  %v354_v39 = vsel %vm1150_vm5, %v1081_v53, %v350_v50  ;;  %v492_v53 = vand.u32 2147483648, %v1067_v0  ;;  %v479_v57 = vsel %vm1144_vm4, %v478_v40, %v474_v29 }
 0x139   :  { %v485_v61 = vadd.f32 %v1091_v58, %v484_v35  ;;  %774 = vrcp.f32 %v1133_v3  ;;  %v369_v11 = vsel %vm1173_vm8, %v1087_v55, %v365_v60  ;;  %v359_v41 = vsel %vm1128_vm0, %v358_v37, %v354_v39 }
 0x13a   :  { %v1148_v4 = vpop.eup %766  ;;  %776 = vpow2.f32 %v708_v38  ;;  %v387_v32 = vand.u32 2147483648, %v1100_v22  ;;  %v374_v23 = vsel %vm1154_vm6, %v373_v19, %v369_v11  ;;  %vm491_vm11 = vcmp.eq.f32.partialorder %v490_v43, 8.507059e+37 }
 0x13b   :  { %v769_v62 = vpop.eup %768  ;;  %v377_v0 = vmul.f32 %v1148_v4, %v1100_v22  ;;  %v489_v55 = vsel %vm1188_vm10, %v1091_v58, %v485_v61  ;;  %778 = vpow2.f32 %v715_v27  ;;  %v493_v26 = vor.u32 1.1754944e-38, %v492_v53 }
 0x13c   :  { %v1167_v7 = vpop.eup %770  ;;  %v1194_v30 = vadd.f32 1.0, %v769_v62  ;;  %v594_v38 = vmul.f32 %v479_v57, %v894_v1  ;;  %v586_v48 = vmul.f32 %v359_v41, %v900_v5  ;;  %vm610_vm12 = vcmp.gt.f32.partialorder %v479_v57, 0.5 }
 0x13d   :  { %v392_v45 = vmul.f32 %v1167_v7, %v1103_v20  ;;  %780 = vpow2.f32 %v716_v24  ;;  %v494_v21 = vsel %vm491_vm11, %v493_v26, %v489_v55  ;;  %vm602_vm13 = vcmp.gt.f32.partialorder %v359_v41, 0.5 }
 0x13e   :  { %v1202_v46 = vpop.eup %772  ;;  %v378_v27 = vsub.f32 1.0, %v377_v0  ;;  %782 = vrcp.f32 %v1194_v30  ;;  %v587_v31 = vmul.f32 %v374_v23, %v902_v6  ;;  %v385_v49 = vand.u32 2147483647, %v1100_v22 }
 0x13f   :  { %v497_v58 = vmul.f32 %v1202_v46, %v1120_v63  ;;  %v1210_v44 = vpop.eup %774  ;;  %v1215_v50 = vor.u32 1.1754944e-38, %v387_v32  ;;  %v393_v51 = vsub.f32 1.0, %v392_v45  ;;  %vm603_vm14 = vcmp.gt.f32.partialorder %v374_v23, 0.5 }
 0x140   :  { %v777_v35 = vpop.eup %776  ;;  %v1219_v28 = vsel %vm610_vm12, %v894_v1, %v594_v38  ;;  %v400_v60 = vand.u32 2147483647, %v1103_v20  ;;  %v402_v54 = vand.u32 2147483648, %v1103_v20  ;;  %v595_v34 = vmul.f32 %v494_v21, %v896_v2 }
 0x141   :  { %v779_v56 = vpop.eup %778  ;;  %v1226_v36 = vsel %vm602_vm13, %v900_v5, %v586_v48  ;;  %v498_v37 = vsub.f32 1.0, %v497_v58  ;;  %v512_v59 = vmul.f32 %v1210_v44, %v1133_v3  ;;  %vm611_vm15 = vcmp.gt.f32.partialorder %v494_v21, 0.5 }
 0x142   :  { %v379_v29 = vmul.f32 %v1148_v4, %v378_v27  ;;  %v1231_v1 = vadd.f32 1.0, %v777_v35  ;;  %v1233_v62 = vadd.f32 1.0, %v779_v56  ;;  %v1237_v40 = vsel %vm603_vm14, %v902_v6, %v587_v31 }
 0x143   :  { %v781_v39 = vpop.eup %780  ;;  %v1240_v61 = vsel %vm602_vm13, 0.0, %v586_v48  ;;  %v1243_v5 = vsel %vm610_vm12, 0.0, %v594_v38  ;;  %v394_v52 = vmul.f32 %v1167_v7, %v393_v51  ;;  %v1247_v53 = vsel %vm603_vm14, 0.0, %v587_v31 }
 0x144   :  { %v783_v43 = vpop.eup %782  ;;  %v415_v11 = vand.u32 2147483647, %v1194_v30  ;;  %v417_v19 = vand.u32 2147483648, %v1194_v30  ;;  %784 = vrcp.f32 %v1231_v1  ;;  %v1254_v6 = vsel %vm611_vm15, %v896_v2, %v595_v34 }
 0x145   :  { %v499_v57 = vmul.f32 %v1202_v46, %v498_v37  ;;  %v513_v24 = vsub.f32 1.0, %v512_v59  ;;  %v407_v41 = vmul.f32 %v783_v43, %v1194_v30  ;;  %v1259_v25 = vsel %vm611_vm15, 0.0, %v595_v34 }
 0x146   :  { %v1262_v0 = vadd.f32 %v1148_v4, %v379_v29  ;;  %v1264_v55 = vadd.f32 1.0, %v781_v39  ;;  %786 = vrcp.f32 %v1233_v62  ;;  %v1268_v32 = vadd.f32 %v1167_v7, %v394_v52 }
 0x147   :  { %v408_v2 = vsub.f32 1.0, %v407_v41  ;;  %v430_v45 = vand.u32 2147483647, %v1231_v1  ;;  %v432_v23 = vand.u32 2147483648, %v1231_v1  ;;  %vm411_vm0 = vweird.f32 %v1194_v30 }
 0x148   :  { %vm1273_vm1 = vcmp.eq.f32.partialorder %v415_v11, 8.507059e+37  ;;  %v418_v38 = vor.u32 1.1754944e-38, %v417_v19  ;;  %v537_v48 = vand.u32 2147483648, %v1233_v62  ;;  %v1279_v58 = vadd.f32 %v1202_v46, %v499_v57 }
 0x149   :  { %v1282_v21 = vmul.f32 %v1210_v44, %v513_v24  ;;  %v535_v27 = vand.u32 2147483647, %v1233_v62  ;;  %v183_v31 = vmul.f32 %v1061_v47, %v990_v9  ;;  %v409_v35 = vmul.f32 %v783_v43, %v408_v2 }
 0x14a   :  { %v785_v51 = vpop.eup %784  ;;  %vm412_vm2 = vweird.f32 %v783_v43  ;;  %788 = vrcp.f32 %v1264_v55  ;;  %v174_v56 = vmul.f32 %v1056_v33, %v997_v16  ;;  %vm426_vm3 = vweird.f32 %v1231_v1 }
 0x14b   :  { %v422_v34 = vmul.f32 %v785_v51, %v1231_v1  ;;  %vm1292_vm4 = vcmp.eq.f32.partialorder %v430_v45, 8.507059e+37  ;;  %v433_v59 = vor.u32 1.1754944e-38, %v432_v23  ;;  %v410_v39 = vadd.f32 %v783_v43, %v409_v35  ;;  %vm413_vm6 = vmor %vm411_vm0, %vm412_vm2  ;;  %v240_v23 = vpop.permute.xlu1 %239 }
 0x14c   :  { %v787_v29 = vpop.eup %786  ;;  %vm531_vm5 = vweird.f32 %v1233_v62  ;;  %v538_v9 = vor.u32 1.1754944e-38, %v537_v48  ;;  %v552_v47 = vand.u32 2147483648, %v1264_v55  ;;  %vm1301_vm7 = vcmp.eq.f32.partialorder %v535_v27, 8.507059e+37 }
 0x14d   :  { %v423_v16 = vsub.f32 1.0, %v422_v34  ;;  %v527_v52 = vmul.f32 %v787_v29, %v1233_v62  ;;  %v550_v19 = vand.u32 2147483647, %v1264_v55  ;;  %v175_v57 = vmul.f32 %v1056_v33, %v999_v15 }
 0x14e   :  { %v414_v24 = vsel %vm413_vm6, %v783_v43, %v410_v39  ;;  %vm427_vm8 = vweird.f32 %v785_v51  ;;  %vm532_vm9 = vweird.f32 %v787_v29  ;;  %v256_v41 = vmul.f32 %v1032_v14, %v174_v56 }
 0x14f   :  { %v419_v30 = vsel %vm1273_vm1, %v418_v38, %v414_v24  ;;  %v424_v2 = vmul.f32 %v785_v51, %v423_v16  ;;  %v528_v45 = vsub.f32 1.0, %v527_v52  ;;  %vm546_vm10 = vweird.f32 %v1264_v55  ;;  %vm428_vm15 = vmor %vm426_vm3, %vm427_vm8 }
 0x150   :  { %v257_v48 = vmul.f32 %v1032_v14, %v175_v57  ;;  %v789_v27 = vpop.eup %788  ;;  %v553_v35 = vor.u32 1.1754944e-38, %v552_v47  ;;  %v590_v34 = vmul.f32 %v419_v30, %v917_v17  ;;  %vm606_vm11 = vcmp.gt.f32.partialorder %v419_v30, 0.5  ;;  %vm533_vm3 = vmor %vm531_vm5, %vm532_vm9 }
 0x151   :  { %v264_v15 = vmul.f32 %v1032_v14, %v1109_v42  ;;  %vm382_vm12 = vweird.f32 %v1148_v4  ;;  %v425_v33 = vadd.f32 %v785_v51, %v424_v2  ;;  %v529_v43 = vmul.f32 %v787_v29, %v528_v45 }
 0x152   :  { %v542_v26 = vmul.f32 %v789_v27, %v1264_v55  ;;  %vm1318_vm13 = vcmp.eq.f32.partialorder %v550_v19, 8.507059e+37  ;;  %v265_v56 = vmul.f32 %v1032_v14, %v183_v31  ;;  %vm397_vm14 = vweird.f32 %v1167_v7 }
 0x153   :  { %v622_v42 = vsel %vm606_vm11, %v917_v17, %v590_v34  ;;  %v638_v39 = vsel %vm606_vm11, 0.0, %v590_v34  ;;  %v272_v47 = vadd.f32 %v256_v41, %v240_v23  ;;  %v273_v16 = vadd.f32 %v257_v48, %v240_v23 }
 0x154   :  { %vm381_vm0 = vweird.f32 %v1100_v22  ;;  %vm502_vm1 = vweird.f32 %v1202_v46  ;;  %v429_v52 = vsel %vm428_vm15, %v785_v51, %v425_v33  ;;  %v530_v19 = vadd.f32 %v787_v29, %v529_v43 }
 0x155   :  { %v543_v57 = vsub.f32 1.0, %v542_v26  ;;  %v650_v14 = vadd.f32 %v638_v39, %v1226_v36  ;;  %vm396_vm2 = vweird.f32 %v1103_v20  ;;  %v434_v1 = vsel %vm1292_vm4, %v433_v59, %v429_v52  ;;  %vm1370_vm11 = vmor %vm381_vm0, %vm382_vm12 }
 0x156   :  { %vm547_vm6 = vweird.f32 %v789_v27  ;;  %v666_v17 = vadd.f32 %v1240_v61, %v622_v42  ;;  %v280_v31 = vadd.f32 %v264_v15, %v240_v23  ;;  %v534_v24 = vsel %vm533_vm3, %v787_v29, %v530_v19  ;;  %vm1383_vm15 = vmor %vm396_vm2, %vm397_vm14 }
 0x157   :  { %v544_v41 = vmul.f32 %v789_v27, %v543_v57  ;;  %v591_v51 = vmul.f32 %v434_v1, %v919_v18  ;;  %vm607_vm8 = vcmp.gt.f32.partialorder %v434_v1, 0.5  ;;  %658 = vst [vmem:[#allocation5] sm:$0xff] %v650_v14  ;;  %v539_v36 = vsel %vm1301_vm7, %v538_v9, %v534_v24  ;;  %vm548_vm7 = vmor %vm546_vm10, %vm547_vm6  ;;  %v806_v14 = vld [vmem:[#allocation2 + $0x50] sm:$0xff] }
 0x158   :  { %674 = vst [vmem:[#allocation5 + $0x20] sm:$0xff] %v666_v17  ;;  %v281_v37 = vadd.f32 %v265_v56, %v240_v23  ;;  %v709_v59 = vmul.f32 -1.442695, %v272_v47  ;;  %v710_v30 = vmul.f32 -1.442695, %v273_v16  ;;  %v598_v62 = vmul.f32 %v539_v36, %v908_v10  ;;  %v807_v24 = vld [vmem:[#allocation2 + $0x10] sm:$0xff] }
 0x159   :  { %v545_v2 = vadd.f32 %v789_v27, %v544_v41  ;;  %vm614_vm4 = vcmp.gt.f32.partialorder %v539_v36, 0.5  ;;  %v623_v61 = vsel %vm607_vm8, %v919_v18, %v591_v51  ;;  %vm1345_vm5 = vcmp.eq.f32.partialorder %v385_v49, 8.507059e+37 }
 0x15a   :  { %vm1351_vm9 = vcmp.eq.f32.partialorder %v400_v60, 8.507059e+37  ;;  %v639_v11 = vsel %vm607_vm8, 0.0, %v591_v51  ;;  %v667_v45 = vadd.f32 %v1247_v53, %v623_v61  ;;  %790 = vpow2.f32 %v709_v59  ;;  %v808_v51 = vld [vmem:[#allocation2 + $0x18] sm:$0xff] }
 0x15b   :  { %v717_v18 = vmul.f32 -1.442695, %v280_v31  ;;  %v549_v23 = vsel %vm548_vm7, %v789_v27, %v545_v2  ;;  %v630_v49 = vsel %vm614_vm4, %v908_v10, %v598_v62  ;;  %v646_v48 = vsel %vm614_vm4, 0.0, %v598_v62  ;;  %v1469_v2 = vld [vmem:[#allocation2 + $0x58] sm:$0xff] }
 0x15c   :  { %v651_v34 = vadd.f32 %v639_v11, %v1237_v40  ;;  %v554_v60 = vsel %vm1318_vm13, %v553_v35, %v549_v23  ;;  %v654_v15 = vadd.f32 %v646_v48, %v1219_v28  ;;  %v670_v33 = vadd.f32 %v1243_v5, %v630_v49  ;;  %675 = vst [vmem:[#allocation5 + $0x28] sm:$0xff] %v667_v45 }
 0x15d   :  { %792 = vpow2.f32 %v710_v30  ;;  %v599_v55 = vmul.f32 %v554_v60, %v912_v13  ;;  %vm615_vm10 = vcmp.gt.f32.partialorder %v554_v60, 0.5  ;;  %v718_v53 = vmul.f32 -1.442695, %v281_v37 }
 0x15e   :  { %659 = vst [vmem:[#allocation5 + $0x8] sm:$0xff] %v651_v34  ;;  %794 = vpow2.f32 %v717_v18  ;;  %v403_v28 = vor.u32 1.1754944e-38, %v402_v54  ;;  %vm501_vm13 = vweird.f32 %v1120_v63  ;;  %v505_v40 = vand.u32 2147483647, %v1120_v63 }
 0x15f   :  { %v507_v5 = vand.u32 2147483648, %v1120_v63  ;;  %662 = vst [vmem:[#allocation5 + $0x40] sm:$0xff] %v654_v15  ;;  %v522_v27 = vand.u32 2147483648, %v1133_v3  ;;  %v631_v35 = vsel %vm615_vm10, %v912_v13, %v599_v55  ;;  %v647_v54 = vsel %vm615_vm10, 0.0, %v599_v55  ;;  %vm1399_vm12 = vmor %vm501_vm13, %vm502_vm1 }
 0x160   :  { %678 = vst [vmem:[#allocation5 + $0x60] sm:$0xff] %v670_v33  ;;  %796 = vpow2.f32 %v718_v53  ;;  %v791_v43 = vpop.eup %790  ;;  %v384_v63 = vsel %vm1370_vm11, %v1148_v4, %v1262_v0  ;;  %v399_v20 = vsel %vm1383_vm15, %v1167_v7, %v1268_v32  ;;  %v655_v13 = vadd.f32 %v647_v54, %v1254_v6 }
 0x161   :  { %v671_v38 = vadd.f32 %v1259_v25, %v631_v35  ;;  %v504_v4 = vsel %vm1399_vm12, %v1202_v46, %v1279_v58  ;;  %v515_v0 = vadd.f32 %v1210_v44, %v1282_v21  ;;  %vm517_vm14 = vweird.f32 %v1210_v44 }
 0x162   :  { %v1412_v7 = vadd.f32 1.0, %v791_v43  ;;  %vm506_vm0 = vcmp.eq.f32.partialorder %v505_v40, 8.507059e+37  ;;  %v508_v56 = vor.u32 1.1754944e-38, %v507_v5  ;;  %vm516_vm1 = vweird.f32 %v1133_v3  ;;  %663 = vst [vmem:[#allocation5 + $0x48] sm:$0xff] %v655_v13 }
 0x163   :  { %v793_v32 = vpop.eup %792  ;;  %v520_v6 = vand.u32 2147483647, %v1133_v3  ;;  %v389_v46 = vsel %vm1345_vm5, %v1215_v50, %v384_v63  ;;  %v1421_v58 = vsel %vm1351_vm9, %v403_v28, %v399_v20  ;;  %679 = vst [vmem:[#allocation5 + $0x68] sm:$0xff] %v671_v38  ;;  %vm1430_vm2 = vmor %vm516_vm1, %vm517_vm14  ;;  %v523_v16 = vor.u32 1.1754944e-38, %v522_v27  ;;  %v811_v3 = vld [vmem:[#allocation2 + $0x38] sm:$0xff] }
 0x164   :  { %v795_v25 = vpop.eup %794  ;;  %v1423_v21 = vadd.f32 1.0, %v793_v32  ;;  %798 = vrcp.f32 %v1412_v7  ;;  %v1426_v42 = vsel %vm506_vm0, %v508_v56, %v504_v4  ;;  %v519_v47 = vsel %vm1430_vm2, %v1210_v44, %v515_v0 }
 0x165   :  { %v1434_v39 = vadd.f32 1.0, %v795_v25  ;;  %v588_v52 = vmul.f32 %v389_v46, %v904_v8  ;;  %v1443_v19 = vmul.f32 %v1421_v58, %v910_v12  ;;  %vm521_vm3 = vcmp.eq.f32.partialorder %v520_v6, 8.507059e+37 }
 0x166   :  { %v797_v50 = vpop.eup %796  ;;  %800 = vrcp.f32 %v1423_v21  ;;  %v1449_v1 = vmul.f32 %v806_v14, %v1426_v42  ;;  %vm604_vm6 = vcmp.gt.f32.partialorder %v389_v46, 0.5  ;;  %vm605_vm8 = vcmp.gt.f32.partialorder %v1421_v58, 0.5 }
 0x167   :  { %v1445_v57 = vadd.f32 1.0, %v797_v50  ;;  %802 = vrcp.f32 %v1434_v39  ;;  %v1452_v44 = vsel %vm521_vm3, %v523_v16, %v519_v47  ;;  %vm612_vm4 = vcmp.gt.f32.partialorder %v1426_v42, 0.5  ;;  %v812_v47 = vld [vmem:[#allocation2 + $0x70] sm:$0xff] }
 0x168   :  { %v445_v8 = vand.u32 2147483647, %v1412_v7  ;;  %v447_v17 = vand.u32 2147483648, %v1412_v7  ;;  %v460_v31 = vand.u32 2147483647, %v1423_v21  ;;  %v1459_v41 = vsel %vm604_vm6, %v807_v24, %v588_v52 }
 0x169   :  { %804 = vrcp.f32 %v1445_v57  ;;  %v1464_v36 = vsel %vm605_vm8, %v808_v51, %v1443_v19  ;;  %v1466_v37 = vsel %vm604_vm6, 0.0, %v588_v52  ;;  %v1473_v62 = vmul.f32 %v1469_v2, %v1452_v44 }
 0x16a   :  { %v799_v12 = vpop.eup %798  ;;  %v1478_v61 = vsel %vm612_vm4, %v806_v14, %v1449_v1  ;;  %vm441_vm5 = vweird.f32 %v1412_v7  ;;  %v462_v29 = vand.u32 2147483648, %v1423_v21  ;;  %vm1482_vm9 = vcmp.eq.f32.partialorder %v445_v8, 8.507059e+37 }
 0x16b   :  { %v437_v59 = vmul.f32 %v799_v12, %v1412_v7  ;;  %vm456_vm7 = vweird.f32 %v1423_v21  ;;  %v448_v23 = vor.u32 1.1754944e-38, %v447_v17  ;;  %vm1488_vm10 = vcmp.eq.f32.partialorder %v460_v31, 8.507059e+37  ;;  %v810_v7 = vld [vmem:[#allocation2 + $0x30] sm:$0xff]  ;;  %v813_v31 = vld [vmem:[#allocation2 + $0x78] sm:$0xff] }
 0x16c   :  { %v801_v30 = vpop.eup %800  ;;  %vm561_vm11 = vweird.f32 %v1434_v39  ;;  %vm442_vm13 = vweird.f32 %v799_v12  ;;  %v565_v33 = vand.u32 2147483647, %v1434_v39  ;;  %v463_v55 = vor.u32 1.1754944e-38, %v462_v29 }
 0x16d   :  { %v803_v9 = vpop.eup %802  ;;  %v438_v11 = vsub.f32 1.0, %v437_v59  ;;  %v452_v18 = vmul.f32 %v801_v30, %v1423_v21  ;;  %v567_v10 = vand.u32 2147483648, %v1434_v39  ;;  %vm613_vm15 = vcmp.gt.f32.partialorder %v1452_v44, 0.5  ;;  %vm443_vm0 = vmor %vm441_vm5, %vm442_vm13 }
 0x16e   :  { %v557_v48 = vmul.f32 %v803_v9, %v1434_v39  ;;  %vm457_vm12 = vweird.f32 %v801_v30  ;;  %vm576_vm14 = vweird.f32 %v1445_v57  ;;  %vm562_vm1 = vweird.f32 %v803_v9 }
 0x16f   :  { %v805_v34 = vpop.eup %804  ;;  %v439_v60 = vmul.f32 %v799_v12, %v438_v11  ;;  %v453_v15 = vsub.f32 1.0, %v452_v18  ;;  %v580_v35 = vand.u32 2147483647, %v1445_v57  ;;  %vm1502_vm2 = vcmp.eq.f32.partialorder %v565_v33, 8.507059e+37  ;;  %vm458_vm3 = vmor %vm456_vm7, %vm457_vm12 }
 0x170   :  { %v558_v53 = vsub.f32 1.0, %v557_v48  ;;  %v572_v28 = vmul.f32 %v805_v34, %v1445_v57  ;;  %v582_v20 = vand.u32 2147483648, %v1445_v57  ;;  %vm577_vm6 = vweird.f32 %v805_v34  ;;  %vm563_vm5 = vmor %vm561_vm11, %vm562_vm1 }
 0x171   :  { %v440_v40 = vadd.f32 %v799_v12, %v439_v60  ;;  %v454_v5 = vmul.f32 %v801_v30, %v453_v15  ;;  %v568_v0 = vor.u32 1.1754944e-38, %v567_v10  ;;  %vm578_vm7 = vmor %vm576_vm14, %vm577_vm6  ;;  %v637_v59 = vsel %vm605_vm8, 0.0, %v1443_v19 }
 0x172   :  { %v559_v22 = vmul.f32 %v803_v9, %v558_v53  ;;  %v573_v27 = vsub.f32 1.0, %v572_v28  ;;  %v583_v21 = vor.u32 1.1754944e-38, %v582_v20  ;;  %v644_v58 = vsel %vm612_vm4, 0.0, %v1449_v1 }
 0x173   :  { %v444_v54 = vsel %vm443_vm0, %v799_v12, %v440_v40  ;;  %v455_v43 = vadd.f32 %v801_v30, %v454_v5 }
 0x174   :  { %v449_v26 = vsel %vm1482_vm9, %v448_v23, %v444_v54  ;;  %v560_v13 = vadd.f32 %v803_v9, %v559_v22  ;;  %v574_v38 = vmul.f32 %v805_v34, %v573_v27  ;;  %vm581_vm9 = vcmp.eq.f32.partialorder %v580_v35, 8.507059e+37 }
 0x175   :  { %v459_v4 = vsel %vm458_vm3, %v801_v30, %v455_v43  ;;  %v592_v32 = vmul.f32 %v810_v7, %v449_v26  ;;  %vm608_vm13 = vcmp.gt.f32.partialorder %v449_v26, 0.5 }
 0x176   :  { %v464_v56 = vsel %vm1488_vm10, %v463_v55, %v459_v4  ;;  %v564_v6 = vsel %vm563_vm5, %v803_v9, %v560_v13  ;;  %v575_v25 = vadd.f32 %v805_v34, %v574_v38 }
 0x177   :  { %v569_v46 = vsel %vm1502_vm2, %v568_v0, %v564_v6  ;;  %v593_v39 = vmul.f32 %v811_v3, %v464_v56  ;;  %vm609_vm11 = vcmp.gt.f32.partialorder %v464_v56, 0.5  ;;  %v640_v52 = vsel %vm608_vm13, 0.0, %v592_v32 }
 0x178   :  { %v579_v50 = vsel %vm578_vm7, %v805_v34, %v575_v25  ;;  %v600_v16 = vmul.f32 %v812_v47, %v569_v46  ;;  %vm616_vm12 = vcmp.gt.f32.partialorder %v569_v46, 0.5  ;;  %v624_v8 = vsel %vm608_vm13, %v810_v7, %v592_v32 }
 0x179   :  { %v584_v14 = vsel %vm581_vm9, %v583_v21, %v579_v50  ;;  %v641_v12 = vsel %vm609_vm11, 0.0, %v593_v39  ;;  %v652_v17 = vadd.f32 %v640_v52, %v1459_v41  ;;  %v625_v57 = vsel %vm609_vm11, %v811_v3, %v593_v39 }
 0x17a   :  { %v601_v24 = vmul.f32 %v813_v31, %v584_v14  ;;  %vm617_vm10 = vcmp.gt.f32.partialorder %v584_v14, 0.5  ;;  %v648_v51 = vsel %vm616_vm12, 0.0, %v600_v16  ;;  %v632_v30 = vsel %vm616_vm12, %v812_v47, %v600_v16 }
 0x17b   :  { %v653_v29 = vadd.f32 %v641_v12, %v1464_v36  ;;  %v656_v9 = vadd.f32 %v648_v51, %v1478_v61  ;;  %660 = vst [vmem:[#allocation5 + $0x10] sm:$0xff] %v652_v17  ;;  %v629_v41 = vsel %vm613_vm15, %v1469_v2, %v1473_v62  ;;  %v668_v18 = vadd.f32 %v1466_v37, %v624_v8 }
 0x17c   :  { %v633_v11 = vsel %vm617_vm10, %v813_v31, %v601_v24  ;;  %v649_v45 = vsel %vm617_vm10, 0.0, %v601_v24  ;;  %v669_v23 = vadd.f32 %v637_v59, %v625_v57  ;;  %v645_v36 = vsel %vm613_vm15, 0.0, %v1473_v62 }
 0x17d   :  { %v657_v19 = vadd.f32 %v649_v45, %v629_v41  ;;  %661 = vst [vmem:[#allocation5 + $0x18] sm:$0xff] %v653_v29  ;;  %v672_v61 = vadd.f32 %v644_v58, %v632_v30  ;;  %v673_v37 = vadd.f32 %v645_v36, %v633_v11 }
 0x17e   :  { %664 = vst [vmem:[#allocation5 + $0x50] sm:$0xff] %v656_v9 }
 0x17f   :  { %665 = vst [vmem:[#allocation5 + $0x58] sm:$0xff] %v657_v19 }
 0x180   :  { %676 = vst [vmem:[#allocation5 + $0x30] sm:$0xff] %v668_v18 }
 0x181   :  { %677 = vst [vmem:[#allocation5 + $0x38] sm:$0xff] %v669_v23 }
 0x182   :  { %680 = vst [vmem:[#allocation5 + $0x70] sm:$0xff] %v672_v61 }
 0x183   :  { %681 = vst [vmem:[#allocation5 + $0x78] sm:$0xff] %v673_v37 }
 0x184   :  { %694 = dma.vmem_to_hbm [thread:$0]  %s687_s23, 2048, %s689_s26, [#allocation4], %s867_s14, %s867_s14, %s868_s15  }
 0x185   :  { %864 = dma.done.wait [#allocation4], 2048  }
 0x186   :  { %865 = vsyncadd [#allocation4], 4294965248 }
 0x187   :  { %699 = vsyncpa [#allocation3], 1 }
 0x188   :  { %700 = vsyncpa [#allocation4], 1 }

</bundles_post_ra>
